<compile_context>
chip_gen: v6e
topology: v6e:2x2x1
jax: 0.10.0
libtpu: 0.0.40
codegen_flags: <defaults>
</compile_context>

<pallas_src>
import functools

import jax
import jax.numpy as jnp
from jax import lax
from jax.experimental import pallas as pl
from jax.experimental.pallas import tpu as pltpu

EPS = 1e-5


def _round_up(v, m):
    return (v + m - 1) // m * m


def _prenorm2_kernel(x_ref, x2_ref, gamma_ref, beta_ref, o1_ref, o2_ref, *, d_true):
    # x_ref / x2_ref: (tile_rows, D_pad); gamma/beta: (1, D_pad).
    g = gamma_ref[...].astype(jnp.float32)
    b = beta_ref[...].astype(jnp.float32)
    d_pad = x_ref.shape[-1]
    inv_d = jnp.float32(1.0 / d_true)

    if d_pad != d_true:
        lane = lax.broadcasted_iota(jnp.int32, (1, d_pad), 1)
        mask = lane < d_true
    else:
        mask = None

    def _ln(in_ref, out_ref):
        x = in_ref[...].astype(jnp.float32)
        # Padded lanes are zero, so the plain sum is the true-D sum.
        mean = jnp.sum(x, axis=-1, keepdims=True) * inv_d
        centered = x - mean
        if mask is not None:
            centered = jnp.where(mask, centered, 0.0)
        var = jnp.sum(centered * centered, axis=-1, keepdims=True) * inv_d  # biased, like torch
        inv = lax.rsqrt(var + EPS)
        out_ref[...] = (centered * (inv * g) + b).astype(out_ref.dtype)

    _ln(x_ref, o1_ref)
    _ln(x2_ref, o2_ref)


def prenorm2_layernorm_pallas(x, x2, gamma, beta):
    """Shared LayerNorm over the last dim of x and x2 (same gamma/beta), fused."""
    assert x.shape == x2.shape, "PreNorm2 expects x and x2 with matching shapes"
    orig_shape = x.shape
    D = orig_shape[-1]
    R = 1
    for s in orig_shape[:-1]:
        R *= s

    x2d = x.reshape(R, D)
    x2_2d = x2.reshape(R, D)
    gamma2d = gamma.reshape(1, D)
    beta2d = beta.reshape(1, D)

    # Lane-dense layout: pad D to a multiple of 128 (padding is masked out of
    # the statistics inside the kernel and sliced off afterwards).
    D_pad = _round_up(D, 128)
    if D_pad != D:
        pad = ((0, 0), (0, D_pad - D))
        x2d = jnp.pad(x2d, pad)
        x2_2d = jnp.pad(x2_2d, pad)
        gamma2d = jnp.pad(gamma2d, pad)
        beta2d = jnp.pad(beta2d, pad)

    itemsize = jnp.dtype(x.dtype).itemsize
    row_mult = max(8, 32 // itemsize)  # f32 -> 8, bf16 -> 16, int8/fp8 -> 32

    # Tile selection: largest row tile within a conservative VMEM budget.
    # Per-row estimate: 4 streams (x, x2, o1, o2) double-buffered in native dtype
    # plus ~4 f32 working copies inside the body.
    vmem_budget = 16 * 1024 * 1024
    bytes_per_row = D_pad * (8 * itemsize + 16)
    cap = max(row_mult, min(1024, vmem_budget // bytes_per_row))
    tile_rows = min(cap, R)
    if tile_rows != R:
        tile_rows = max(row_mult, (tile_rows // row_mult) * row_mult)
    grid = (pl.cdiv(R, tile_rows),)

    row_spec = pl.BlockSpec((tile_rows, D_pad), lambda i: (i, 0))
    vec_spec = pl.BlockSpec((1, D_pad), lambda i: (0, 0))

    cost = pl.CostEstimate(
        flops=16 * R * D,
        transcendentals=2 * R,
        bytes_accessed=4 * R * D * itemsize + 2 * D * itemsize,
    )

    out1, out2 = pl.pallas_call(
        functools.partial(_prenorm2_kernel, d_true=D),
        out_shape=(
            jax.ShapeDtypeStruct((R, D_pad), x.dtype),
            jax.ShapeDtypeStruct((R, D_pad), x2.dtype),
        ),
        grid_spec=pltpu.PrefetchScalarGridSpec(
            num_scalar_prefetch=0,
            grid=grid,
            in_specs=[row_spec, row_spec, vec_spec, vec_spec],
            out_specs=[row_spec, row_spec],
        ),
        compiler_params=pltpu.CompilerParams(
            dimension_semantics=("parallel",),
            vmem_limit_bytes=32 * 1024 * 1024,
        ),
        cost_estimate=cost,
    )(x2d, x2_2d, gamma2d, beta2d)

    if D_pad != D:
        out1 = out1[:, :D]
        out2 = out2[:, :D]
    return out1.reshape(orig_shape), out2.reshape(orig_shape)


def prenorm2_forward(x, x2, gamma, beta, fn, **kwargs):
    """PreNorm2.forward: fn(norm(x), norm(x2), **kwargs) with a shared LayerNorm."""
    nx, nx2 = prenorm2_layernorm_pallas(x, x2, gamma, beta)
    # TODO(synk): `fn` is an arbitrary injected submodule in the PyTorch code; if it
    # is elementwise it could be fused into the kernel to save one HBM round trip.
    return fn(nx, nx2, **kwargs)


def _layernorm_ref(x, gamma, beta):
    x32 = x.astype(jnp.float32)
    mean = jnp.mean(x32, axis=-1, keepdims=True)
    var = jnp.mean((x32 - mean) ** 2, axis=-1, keepdims=True)
    y = (x32 - mean) * lax.rsqrt(var + EPS) * gamma + beta
    return y.astype(x.dtype)


if __name__ == "__main__":
    key = jax.random.PRNGKey(0)
    k1, k2, k3, k4, k5, k6 = jax.random.split(key, 6)

    # Small shapes consistent with the module: (batch, seq, hidden).
    B, N, D = 2, 8, 32
    x = jax.random.normal(k1, (B, N, D), dtype=jnp.float32)
    x2 = jax.random.normal(k2, (B, N, D), dtype=jnp.float32)
    gamma = jnp.ones((D,), jnp.float32) + 0.1 * jax.random.normal(k3, (D,), jnp.float32)
    beta = 0.1 * jax.random.normal(k4, (D,), jnp.float32)

    # Stand-in for the injected `fn` submodule (elementwise combine).
    fn = lambda a, b: a + b

    out = jax.block_until_ready(prenorm2_forward(x, x2, gamma, beta, fn))
    ref = fn(_layernorm_ref(x, gamma, beta), _layernorm_ref(x2, gamma, beta))
    assert out.shape == (B, N, D)
    assert jnp.allclose(out, ref, atol=1e-5, rtol=1e-5), "mismatch vs reference (padded-D path)"

    # Second check: lane-aligned D with an awkward row count (no padding path).
    B2, N2, D2 = 1, 5, 128
    xb = jax.random.normal(k5, (B2, N2, D2), dtype=jnp.float32)
    xb2 = jax.random.normal(k6, (B2, N2, D2), dtype=jnp.float32)
    gb = jnp.ones((D2,), jnp.float32)
    bb = jnp.zeros((D2,), jnp.float32)
    outb = jax.block_until_ready(prenorm2_forward(xb, xb2, gb, bb, fn))
    refb = fn(_layernorm_ref(xb, gb, bb), _layernorm_ref(xb2, gb, bb))
    assert jnp.allclose(outb, refb, atol=1e-5, rtol=1e-5), "mismatch vs reference (D=128 path)"

    print("KERNEL_OK")
</pallas_src>

<mosaic_0001>
module attributes {stable_mosaic.version = 11 : i64} {
  func.func @_prenorm2_kernel(%arg0: i32, %arg1: memref<16x128xf32, #tpu.memory_space<vmem>>, %arg2: memref<16x128xf32, #tpu.memory_space<vmem>>, %arg3: memref<1x128xf32, #tpu.memory_space<vmem>>, %arg4: memref<1x128xf32, #tpu.memory_space<vmem>>, %arg5: memref<16x128xf32, #tpu.memory_space<vmem>>, %arg6: memref<16x128xf32, #tpu.memory_space<vmem>>) attributes {dimension_semantics = [#tpu.dimension_semantics<parallel>], iteration_bounds = array<i64: 1>, scalar_prefetch = 0 : i64, scratch_operands = 0 : i64, tpu.core_type = #tpu.core_type<tc>, window_params = [{transform_indices = @transform_0, window_bounds = array<i64: 16, 128>}, {transform_indices = @transform_1, window_bounds = array<i64: 16, 128>}, {pipeline_mode = #tpu.pipeline_mode<synchronous>, transform_indices = @transform_2, window_bounds = array<i64: 1, 128>}, {pipeline_mode = #tpu.pipeline_mode<synchronous>, transform_indices = @transform_3, window_bounds = array<i64: 1, 128>}, {transform_indices = @transform_4, window_bounds = array<i64: 16, 128>}, {transform_indices = @transform_5, window_bounds = array<i64: 16, 128>}]} {
    %c0 = arith.constant 0 : index
    %c0_0 = arith.constant 0 : index
    %0 = vector.load %arg3[%c0, %c0_0] : memref<1x128xf32, #tpu.memory_space<vmem>>, vector<1x128xf32>
    %c0_1 = arith.constant 0 : index
    %c0_2 = arith.constant 0 : index
    %1 = vector.load %arg4[%c0_1, %c0_2] : memref<1x128xf32, #tpu.memory_space<vmem>>, vector<1x128xf32>
    %2 = tpu.iota {dimensions = array<i32: 1>} : vector<1x128xi32>
    %c32_i32 = arith.constant 32 : i32
    %3 = vector.broadcast %c32_i32 : i32 to vector<1x128xi32>
    %4 = arith.cmpi slt, %2, %3 : vector<1x128xi32>
    %c0_3 = arith.constant 0 : index
    %c0_4 = arith.constant 0 : index
    %5 = vector.load %arg1[%c0_3, %c0_4] : memref<16x128xf32, #tpu.memory_space<vmem>>, vector<16x128xf32>
    %cst = arith.constant dense<0.000000e+00> : vector<16xf32>
    %6 = vector.multi_reduction <add>, %5, %cst [1] : vector<16x128xf32> to vector<16xf32>
    %7 = vector.shape_cast %6 : vector<16xf32> to vector<16x1xf32>
    %cst_5 = arith.constant 3.125000e-02 : f32
    %8 = vector.broadcast %cst_5 : f32 to vector<16x1xf32>
    %9 = arith.mulf %7, %8 : vector<16x1xf32>
    %10 = vector.broadcast %9 : vector<16x1xf32> to vector<16x128xf32>
    %11 = arith.subf %5, %10 : vector<16x128xf32>
    %cst_6 = arith.constant 0.000000e+00 : f32
    %12 = vector.shape_cast %4 : vector<1x128xi1> to vector<1x128xi1>
    %13 = vector.broadcast %12 : vector<1x128xi1> to vector<16x128xi1>
    %14 = vector.broadcast %cst_6 : f32 to vector<16x128xf32>
    %15 = arith.select %13, %11, %14 : vector<16x128xi1>, vector<16x128xf32>
    %16 = arith.mulf %15, %15 : vector<16x128xf32>
    %cst_7 = arith.constant dense<0.000000e+00> : vector<16xf32>
    %17 = vector.multi_reduction <add>, %16, %cst_7 [1] : vector<16x128xf32> to vector<16xf32>
    %18 = vector.shape_cast %17 : vector<16xf32> to vector<16x1xf32>
    %cst_8 = arith.constant 3.125000e-02 : f32
    %19 = vector.broadcast %cst_8 : f32 to vector<16x1xf32>
    %20 = arith.mulf %18, %19 : vector<16x1xf32>
    %cst_9 = arith.constant 9.99999974E-6 : f32
    %21 = vector.broadcast %cst_9 : f32 to vector<16x1xf32>
    %22 = arith.addf %20, %21 : vector<16x1xf32>
    %23 = math.rsqrt %22 : vector<16x1xf32>
    %24 = vector.broadcast %23 : vector<16x1xf32> to vector<16x128xf32>
    %25 = vector.broadcast %0 : vector<1x128xf32> to vector<16x128xf32>
    %26 = arith.mulf %24, %25 : vector<16x128xf32>
    %27 = arith.mulf %15, %26 : vector<16x128xf32>
    %28 = vector.broadcast %1 : vector<1x128xf32> to vector<16x128xf32>
    %29 = arith.addf %27, %28 : vector<16x128xf32>
    %c0_10 = arith.constant 0 : index
    %c0_11 = arith.constant 0 : index
    %30 = vector.load %arg5[%c0_10, %c0_11] : memref<16x128xf32, #tpu.memory_space<vmem>>, vector<16x128xf32>
    tpu.vector_store %arg5[%c0_10, %c0_11], %29 {strides = array<i32>} : memref<16x128xf32, #tpu.memory_space<vmem>>, vector<16x128xf32>,
    %c0_12 = arith.constant 0 : index
    %c0_13 = arith.constant 0 : index
    %31 = vector.load %arg2[%c0_12, %c0_13] : memref<16x128xf32, #tpu.memory_space<vmem>>, vector<16x128xf32>
    %cst_14 = arith.constant dense<0.000000e+00> : vector<16xf32>
    %32 = vector.multi_reduction <add>, %31, %cst_14 [1] : vector<16x128xf32> to vector<16xf32>
    %33 = vector.shape_cast %32 : vector<16xf32> to vector<16x1xf32>
    %cst_15 = arith.constant 3.125000e-02 : f32
    %34 = vector.broadcast %cst_15 : f32 to vector<16x1xf32>
    %35 = arith.mulf %33, %34 : vector<16x1xf32>
    %36 = vector.broadcast %35 : vector<16x1xf32> to vector<16x128xf32>
    %37 = arith.subf %31, %36 : vector<16x128xf32>
    %cst_16 = arith.constant 0.000000e+00 : f32
    %38 = vector.shape_cast %4 : vector<1x128xi1> to vector<1x128xi1>
    %39 = vector.broadcast %38 : vector<1x128xi1> to vector<16x128xi1>
    %40 = vector.broadcast %cst_16 : f32 to vector<16x128xf32>
    %41 = arith.select %39, %37, %40 : vector<16x128xi1>, vector<16x128xf32>
    %42 = arith.mulf %41, %41 : vector<16x128xf32>
    %cst_17 = arith.constant dense<0.000000e+00> : vector<16xf32>
    %43 = vector.multi_reduction <add>, %42, %cst_17 [1] : vector<16x128xf32> to vector<16xf32>
    %44 = vector.shape_cast %43 : vector<16xf32> to vector<16x1xf32>
    %cst_18 = arith.constant 3.125000e-02 : f32
    %45 = vector.broadcast %cst_18 : f32 to vector<16x1xf32>
    %46 = arith.mulf %44, %45 : vector<16x1xf32>
    %cst_19 = arith.constant 9.99999974E-6 : f32
    %47 = vector.broadcast %cst_19 : f32 to vector<16x1xf32>
    %48 = arith.addf %46, %47 : vector<16x1xf32>
    %49 = math.rsqrt %48 : vector<16x1xf32>
    %50 = vector.broadcast %49 : vector<16x1xf32> to vector<16x128xf32>
    %51 = vector.broadcast %0 : vector<1x128xf32> to vector<16x128xf32>
    %52 = arith.mulf %50, %51 : vector<16x128xf32>
    %53 = arith.mulf %41, %52 : vector<16x128xf32>
    %54 = vector.broadcast %1 : vector<1x128xf32> to vector<16x128xf32>
    %55 = arith.addf %53, %54 : vector<16x128xf32>
    %c0_20 = arith.constant 0 : index
    %c0_21 = arith.constant 0 : index
    %56 = vector.load %arg6[%c0_20, %c0_21] : memref<16x128xf32, #tpu.memory_space<vmem>>, vector<16x128xf32>
    tpu.vector_store %arg6[%c0_20, %c0_21], %55 {strides = array<i32>} : memref<16x128xf32, #tpu.memory_space<vmem>>, vector<16x128xf32>,
    return
  }
  func.func @transform_0(%arg0: i32) -> (i32, i32) {
    %c0_i32 = arith.constant 0 : i32
    %c0_i32_0 = arith.constant 0 : i32
    return %arg0, %c0_i32 : i32, i32
  }
  func.func @transform_1(%arg0: i32) -> (i32, i32) {
    %c0_i32 = arith.constant 0 : i32
    %c0_i32_0 = arith.constant 0 : i32
    return %arg0, %c0_i32 : i32, i32
  }
  func.func @transform_2(%arg0: i32) -> (i32, i32) {
    %c0_i32 = arith.constant 0 : i32
    %c0_i32_0 = arith.constant 0 : i32
    %c0_i32_1 = arith.constant 0 : i32
    return %c0_i32, %c0_i32_0 : i32, i32
  }
  func.func @transform_3(%arg0: i32) -> (i32, i32) {
    %c0_i32 = arith.constant 0 : i32
    %c0_i32_0 = arith.constant 0 : i32
    %c0_i32_1 = arith.constant 0 : i32
    return %c0_i32, %c0_i32_0 : i32, i32
  }
  func.func @transform_4(%arg0: i32) -> (i32, i32) {
    %c0_i32 = arith.constant 0 : i32
    %c0_i32_0 = arith.constant 0 : i32
    return %arg0, %c0_i32 : i32, i32
  }
  func.func @transform_5(%arg0: i32) -> (i32, i32) {
    %c0_i32 = arith.constant 0 : i32
    %c0_i32_0 = arith.constant 0 : i32
    return %arg0, %c0_i32 : i32, i32
  }
}

</mosaic_0001>

<bundles_post_ra>
// kernel: tpu_custom_call.1
= control target key start
LH: loop header
LB: loop body
LE: loop exit
PB: predicated region body
PF: predicated region fallthrough
CT: control target
= control target key end

     0   :  { %11 = vsyncpa [#allocation3], 0  ;;  %s336_s0 = inlined_call_operand.hbm [shape: f32[16,128], index: 0, kind: input, shape index: {}]   ;;  %s337_s1 = inlined_call_operand.hbm [shape: f32[16,128], index: 1, kind: input, shape index: {}]   ;;  %s338_s2 = inlined_call_operand.vmem [shape: f32[1,128], index: 2, kind: input, shape index: {}]   ;;  %s339_s3 = inlined_call_operand.vmem [shape: f32[1,128], index: 3, kind: input, shape index: {}]   ;;  %s340_s4 = inlined_call_operand.hbm [shape: f32[16,128], index: 4, kind: output, shape index: {0}]   ;;  %s341_s5 = inlined_call_operand.hbm [shape: f32[16,128], index: 5, kind: output, shape index: {1}]  }
   0x1   :  { %12 = vsyncpa [#allocation6], 0 }
   0x2   :  { %13 = vsyncpa [#allocation4], 0 }
   0x3   :  { %14 = vsyncpa [#allocation9], 0  ;;  %s270_s18 = smov [#allocation2]  }
   0x4   :  { %s20_s19 = sshll.u32 %s270_s18, 4  ;;  %s21_s19 = int_to_ptr.vmem [resolvable:$true] %s20_s19 }
   0x5   :  { %s190_s20 = scalar_lea.vmem %s21_s19, 256  ;;  %p195_p1 = scmp.lt.s32.totalorder %s21_s19, %s21_s19 }
   0x6   :  { %p191_p0 = scmp.ne.s32.totalorder %s21_s19, %s190_s20  ;;  %p196_p2 = scmp.lt.s32.totalorder %s190_s20, %s190_s20 }
   0x8   :  { %p197_p3 = por %p196_p2, %p195_p1 }
   0xa   :  { %p198_p4 = pnand %p197_p3, %p191_p0 }
   0xc   :  { %201 = shalt.err (!%p198_p4)
}
   0xd   :  { %s271_s21 = smov 128   ;;  %s272_s22 = smov 8  }
   0xe   :  { %26 = dma.hbm_to_vmem [thread:$0]  %s336_s0, 256, %s21_s19, [#allocation3], %s271_s21, %s271_s21, %s272_s22  }
   0xf   :  { %s273_s25 = smov [#allocation5]  }
  0x10   :  { %s32_s26 = sshll.u32 %s273_s25, 4  ;;  %s33_s26 = int_to_ptr.vmem [resolvable:$true] %s32_s26 }
  0x11   :  { %s210_s27 = scalar_lea.vmem %s33_s26, 256  ;;  %p215_p6 = scmp.lt.s32.totalorder %s33_s26, %s33_s26 }
  0x12   :  { %p211_p5 = scmp.ne.s32.totalorder %s33_s26, %s210_s27  ;;  %p216_p7 = scmp.lt.s32.totalorder %s210_s27, %s210_s27 }
  0x14   :  { %p217_p8 = por %p216_p7, %p215_p6 }
  0x16   :  { %p218_p9 = pnand %p217_p8, %p211_p5 }
  0x18   :  { %221 = shalt.err (!%p218_p9)
}
  0x19   :  { %38 = dma.hbm_to_vmem [thread:$0]  %s337_s1, 256, %s33_s26, [#allocation6], %s271_s21, %s271_s21, %s272_s22  }
  0x1a   :  { %262 = dma.done.wait [#allocation3], 256  }
  0x1b   :  { %263 = vsyncadd [#allocation3], 4294967040 }
  0x1c   :  { %264 = dma.done.wait [#allocation6], 256  }
  0x1d   :  { %265 = vsyncadd [#allocation6], 4294967040  ;;  %v54_v0 = vld [vmem:[#allocation2] sm:$0xff]  ;;  %v100_v1 = vld [vmem:[#allocation5] sm:$0xff]  ;;  %v51_v4 = vlaneseq  ;;  %s274_s7 = smov [#allocation7]  }
  0x1e   :  { %56 = vadd.xlane.f32.xlu0 %v54_v0  ;;  %102 = vadd.xlane.f32.xlu1 %v100_v1  ;;  %v55_v2 = vld [vmem:[#allocation2 + $0x8] sm:$0xff]  ;;  %v101_v3 = vld [vmem:[#allocation5 + $0x8] sm:$0xff]  ;;  %v166_v38 = vld [vmem:[%s338_s2] ss:$0 sm:$0xff]  ;;  %s137_s8 = sshll.u32 %s274_s7, 4  ;;  %s275_s2 = smov [#allocation8]   ;;  %s138_s8 = int_to_ptr.vmem [resolvable:$true] %s137_s8 }
  0x1f   :  { %v52_v5 = vand.u32 127, %v51_v4  ;;  %v167_v41 = vld [vmem:[%s339_s3] ss:$0 sm:$0xff]  ;;  %s149_s9 = sshll.u32 %s275_s2, 4  ;;  %s222_s3 = scalar_lea.vmem %s138_s8, 256  ;;  %s150_s9 = int_to_ptr.vmem [resolvable:$true] %s149_s9 }
  0x20   :  { %p223_p10 = scmp.ne.s32.totalorder %s138_s8, %s222_s3  ;;  %p227_p11 = scmp.lt.s32.totalorder %s138_s8, %s138_s8 }
  0x21   :  { %vm53_vm0 = vcmp.lt.s32.totalorder %v52_v5, 32  ;;  %p228_p12 = scmp.lt.s32.totalorder %s222_s3, %s222_s3 }
  0x22   :  { %58 = vadd.xlane.f32.xlu0 %v55_v2  ;;  %104 = vadd.xlane.f32.xlu1 %v101_v3 }
  0x23   :  { %p229_p13 = por %p228_p12, %p227_p11 }
  0x25   :  { %p230_p0 = pnand %p229_p13, %p223_p10 }
  0xa7   :  { %v57_v6 = vpop.xlane.xlu0 %56  ;;  %v103_v7 = vpop.xlane.xlu1 %102 }
  0xa8   :  { %v60_v8 = vmul.f32 0.03125, %v57_v6  ;;  %v106_v9 = vmul.f32 0.03125, %v103_v7 }
  0xaa   :  { %v62_v10 = vsub.f32 %v54_v0, %v60_v8  ;;  %v108_v11 = vsub.f32 %v100_v1, %v106_v9 }
  0xab   :  { %v59_v12 = vpop.xlane.xlu0 %58  ;;  %v105_v13 = vpop.xlane.xlu1 %104 }
  0xac   :  { %v61_v14 = vmul.f32 0.03125, %v59_v12  ;;  %v107_v15 = vmul.f32 0.03125, %v105_v13  ;;  %v66_v16 = vsel %vm53_vm0, %v62_v10, 0.0  ;;  %v110_v17 = vsel %vm53_vm0, %v108_v11, 0.0 }
  0xad   :  { %v68_v18 = vmul.f32 %v66_v16, %v66_v16  ;;  %v112_v21 = vmul.f32 %v110_v17, %v110_v17 }
  0xae   :  { %v63_v19 = vsub.f32 %v55_v2, %v61_v14  ;;  %v109_v20 = vsub.f32 %v101_v3, %v107_v15 }
  0xaf   :  { %70 = vadd.xlane.f32.xlu0 %v68_v18 }
  0xb0   :  { %v67_v22 = vsel %vm53_vm0, %v63_v19, 0.0  ;;  %v111_v23 = vsel %vm53_vm0, %v109_v20, 0.0 }
  0xb1   :  { %v69_v24 = vmul.f32 %v67_v22, %v67_v22  ;;  %v113_v25 = vmul.f32 %v111_v23, %v111_v23 }
  0xb3   :  { %114 = vadd.xlane.f32.xlu0 %v112_v21  ;;  %72 = vadd.xlane.f32.xlu1 %v69_v24 }
  0xb7   :  { %116 = vadd.xlane.f32.xlu1 %v113_v25 }
 0x138   :  { %v71_v26 = vpop.xlane.xlu0 %70 }
 0x139   :  { %v74_v27 = vmul.f32 0.03125, %v71_v26 }
 0x13b   :  { %v76_v28 = vadd.f32 1e-05, %v74_v27 }
 0x13c   :  { %v73_v29 = vpop.xlane.xlu1 %72  ;;  %v115_v30 = vpop.xlane.xlu0 %114 }
 0x13d   :  { %174 = vrsqrt.f32 %v76_v28  ;;  %v75_v31 = vmul.f32 0.03125, %v73_v29  ;;  %v118_v32 = vmul.f32 0.03125, %v115_v30 }
 0x13f   :  { %v77_v33 = vadd.f32 1e-05, %v75_v31  ;;  %v120_v34 = vadd.f32 1e-05, %v118_v32 }
 0x140   :  { %v117_v35 = vpop.xlane.xlu1 %116 }
 0x141   :  { %176 = vrsqrt.f32 %v77_v33  ;;  %v119_v36 = vmul.f32 0.03125, %v117_v35 }
 0x142   :  { %178 = vrsqrt.f32 %v120_v34 }
 0x143   :  { %v121_v37 = vadd.f32 1e-05, %v119_v36 }
 0x145   :  { %180 = vrsqrt.f32 %v121_v37 }
 0x14a   :  { %v175_v39 = vpop.eup %174 }
 0x14b   :  { %v86_v40 = vmul.f32 %v175_v39, %v166_v38 }
 0x14d   :  { %v88_v42 = vmul.f32 %v86_v40, %v66_v16 }
 0x14e   :  { %v177_v43 = vpop.eup %176 }
 0x14f   :  { %v179_v44 = vpop.eup %178  ;;  %v87_v45 = vmul.f32 %v177_v43, %v166_v38  ;;  %v96_v46 = vadd.f32 %v167_v41, %v88_v42 }
 0x150   :  { %v124_v47 = vmul.f32 %v179_v44, %v166_v38 }
 0x151   :  { %v89_v48 = vmul.f32 %v87_v45, %v67_v22  ;;  %98 = vst [vmem:[#allocation7] sm:$0xff] %v96_v46 }
 0x152   :  { %v181_v49 = vpop.eup %180  ;;  %v126_v50 = vmul.f32 %v124_v47, %v110_v17 }
 0x153   :  { %v97_v51 = vadd.f32 %v167_v41, %v89_v48  ;;  %v125_v52 = vmul.f32 %v181_v49, %v166_v38 }
 0x154   :  { %v128_v53 = vadd.f32 %v167_v41, %v126_v50 }
 0x155   :  { %99 = vst [vmem:[#allocation7 + $0x8] sm:$0xff] %v97_v51  ;;  %v127_v54 = vmul.f32 %v125_v52, %v111_v23 }
 0x156   :  { %233 = shalt.err (!%p230_p0)
}
 0x157   :  { %143 = dma.vmem_to_hbm [thread:$0]  %s138_s8, 256, %s340_s4, [#allocation4], %s271_s21, %s271_s21, %s272_s22   ;;  %130 = vst [vmem:[#allocation8] sm:$0xff] %v128_v53  ;;  %v129_v55 = vadd.f32 %v167_v41, %v127_v54 }
 0x158   :  { %s242_s12 = scalar_lea.vmem %s150_s9, 256  ;;  %p247_p2 = scmp.lt.s32.totalorder %s150_s9, %s150_s9 }
 0x159   :  { %131 = vst [vmem:[#allocation8 + $0x8] sm:$0xff] %v129_v55  ;;  %p243_p1 = scmp.ne.s32.totalorder %s150_s9, %s242_s12  ;;  %p248_p3 = scmp.lt.s32.totalorder %s242_s12, %s242_s12 }
 0x15b   :  { %p249_p4 = por %p248_p3, %p247_p2 }
 0x15d   :  { %p250_p5 = pnand %p249_p4, %p243_p1 }
 0x15f   :  { %253 = shalt.err (!%p250_p5)
}
 0x160   :  { %155 = dma.vmem_to_hbm [thread:$0]  %s150_s9, 256, %s341_s5, [#allocation9], %s271_s21, %s271_s21, %s272_s22  }
 0x161   :  { %266 = dma.done.wait [#allocation4], 256  }
 0x162   :  { %267 = vsyncadd [#allocation4], 4294967040 }
 0x163   :  { %268 = dma.done.wait [#allocation9], 256  }
 0x164   :  { %269 = vsyncadd [#allocation9], 4294967040 }
 0x165   :  { %162 = vsyncpa [#allocation3], 1 }
 0x166   :  { %163 = vsyncpa [#allocation6], 1 }
 0x167   :  { %164 = vsyncpa [#allocation4], 1 }
 0x168   :  { %165 = vsyncpa [#allocation9], 1 }

</bundles_post_ra>
